<compile_context>
chip_gen: v7x
topology: tpu7x:2x2x1
jax: 0.10.0
libtpu: 0.0.40
codegen_flags: <defaults>
</compile_context>

<pallas_src>
import jax
import jax.numpy as jnp
from jax.experimental import pallas as pl
from jax.experimental.pallas import tpu as pltpu

_HP = jax.lax.Precision.HIGHEST  # keep f32 math exact in kernel and reference


def _attention_kernel(uq_ref, up_ref, w1_ref, w2_ref, s_ref):
    # uq_ref : (1, block_q, D)  U_Q tile for this (batch, q-tile) step
    # up_ref : (1, Lp, D)       full U_P slab for this batch element
    # w1_ref : (D, H)           proj_1 weight, stored transposed (x @ W^T)
    # w2_ref : (D, H)           proj_2 weight, stored transposed
    # s_ref  : (1, block_q, Lp) output tile
    uq = uq_ref[0]          # (block_q, D), native dtype
    up = up_ref[0]          # (Lp, D),      native dtype
    w1 = w1_ref[...]        # (D, H)
    w2 = w2_ref[...]        # (D, H)

    # relu(U_Q @ W1^T) and relu(U_P @ W2^T), accumulated in f32 on the MXU.
    q_o = jnp.maximum(
        jnp.dot(uq, w1, preferred_element_type=jnp.float32, precision=_HP), 0.0)
    p_o = jnp.maximum(
        jnp.dot(up, w2, preferred_element_type=jnp.float32, precision=_HP), 0.0)

    # S = U_Q_o @ U_P_o^T : contract the hidden axis of both operands directly
    # (no explicit transpose materialization); feed MXU in the input dtype.
    s = jax.lax.dot_general(
        q_o.astype(uq.dtype), p_o.astype(up.dtype),
        dimension_numbers=(((1,), (1,)), ((), ())),
        preferred_element_type=jnp.float32, precision=_HP)      # (block_q, Lp)

    s_ref[0] = s.astype(s_ref.dtype)


def attention(u_q: jax.Array,
              u_p: jax.Array,
              w1: jax.Array,
              w2: jax.Array,
              *,
              block_q: int | None = None,
              vmem_limit_bytes: int = 64 * 1024 * 1024) -> jax.Array:
    """Pallas Attention.

    Args:
      u_q: [B, Lq, D] query-side activations.
      u_p: [B, Lp, D] passage-side activations.
      w1:  [H, D] proj_1 weight (PyTorch nn.Linear(D, H, bias=False) layout).
      w2:  [H, D] proj_2 weight.
      block_q: optional Lq tile size (default: full Lq resident per step).
      vmem_limit_bytes: scoped VMEM limit passed to Mosaic.

    Returns:
      S: [B, Lq, Lp] similarity matrix, relu(U_Q W1^T) @ relu(U_P W2^T)^T.
    """
    B, Lq, D = u_q.shape
    Bp, Lp, Dp = u_p.shape
    H, Dw = w1.shape
    assert Bp == B and Dp == D and Dw == D and w2.shape == (H, D)

    w1t = w1.T  # (D, H): compute x @ W^T as x @ w1t
    w2t = w2.T  # (D, H)

    bq = Lq if block_q is None else min(block_q, Lq)
    grid = (B, pl.cdiv(Lq, bq))

    itemsize = jnp.dtype(u_q.dtype).itemsize
    cost = pl.CostEstimate(
        flops=2 * B * (Lq * D * H + Lp * D * H + Lq * H * Lp),
        transcendentals=0,
        bytes_accessed=(B * Lq * D + B * Lp * D + 2 * D * H + B * Lq * Lp)
        * itemsize,
    )

    return pl.pallas_call(
        _attention_kernel,
        out_shape=jax.ShapeDtypeStruct((B, Lq, Lp), u_q.dtype),
        grid_spec=pltpu.PrefetchScalarGridSpec(
            num_scalar_prefetch=0,
            grid=grid,
            in_specs=[
                pl.BlockSpec((1, bq, D), lambda b, qi: (b, qi, 0)),   # U_Q tile
                pl.BlockSpec((1, Lp, D), lambda b, qi: (b, 0, 0)),    # U_P slab
                pl.BlockSpec((D, H), lambda b, qi: (0, 0)),           # W1^T
                pl.BlockSpec((D, H), lambda b, qi: (0, 0)),           # W2^T
            ],
            out_specs=pl.BlockSpec((1, bq, Lp), lambda b, qi: (b, qi, 0)),
        ),
        compiler_params=pltpu.CompilerParams(
            dimension_semantics=("parallel", "parallel"),
            vmem_limit_bytes=vmem_limit_bytes,
        ),
        cost_estimate=cost,
    )(u_q, u_p, w1t, w2t)


def _reference(u_q, u_p, w1, w2):
    # Plain-JAX reference matching the PyTorch forward exactly.
    q_o = jax.nn.relu(jnp.einsum("bld,hd->blh", u_q, w1, precision=_HP))
    p_o = jax.nn.relu(jnp.einsum("bld,hd->blh", u_p, w2, precision=_HP))
    return jnp.einsum("bqh,bkh->bqk", q_o, p_o, precision=_HP)


if __name__ == "__main__":
    key = jax.random.PRNGKey(0)
    k_q, k_p, k_w1, k_w2 = jax.random.split(key, 4)

    B, Lq, Lp, D, H = 2, 8, 16, 32, 32
    u_q = jax.random.normal(k_q, (B, Lq, D), dtype=jnp.float32)
    u_p = jax.random.normal(k_p, (B, Lp, D), dtype=jnp.float32)
    # nn.Linear(input_size=D, hidden_size=H, bias=False) -> weight shape (H, D)
    w1 = jax.random.normal(k_w1, (H, D), dtype=jnp.float32) * 0.1
    w2 = jax.random.normal(k_w2, (H, D), dtype=jnp.float32) * 0.1

    out = attention(u_q, u_p, w1, w2)
    out = jax.block_until_ready(out)

    ref = _reference(u_q, u_p, w1, w2)
    assert out.shape == (B, Lq, Lp), out.shape
    assert jnp.allclose(out, ref, atol=2e-3, rtol=2e-3), (
        "mismatch vs reference", float(jnp.max(jnp.abs(out - ref))))

    print("KERNEL_OK")
</pallas_src>

<mosaic_0001>
module attributes {stable_mosaic.version = 11 : i64} {
  func.func @_attention_kernel(%arg0: i32, %arg1: i32, %arg2: memref<1x8x32xf32, #tpu.memory_space<vmem>>, %arg3: memref<1x16x32xf32, #tpu.memory_space<vmem>>, %arg4: memref<32x32xf32, #tpu.memory_space<vmem>>, %arg5: memref<32x32xf32, #tpu.memory_space<vmem>>, %arg6: memref<1x8x16xf32, #tpu.memory_space<vmem>>) attributes {dimension_semantics = [#tpu.dimension_semantics<parallel>, #tpu.dimension_semantics<parallel>], iteration_bounds = array<i64: 2, 1>, scalar_prefetch = 0 : i64, scratch_operands = 0 : i64, tpu.core_type = #tpu.core_type<tc>, window_params = [{transform_indices = @transform_0, window_bounds = array<i64: 1, 8, 32>}, {transform_indices = @transform_1, window_bounds = array<i64: 1, 16, 32>}, {pipeline_mode = #tpu.pipeline_mode<synchronous>, transform_indices = @transform_2, window_bounds = array<i64: 32, 32>}, {pipeline_mode = #tpu.pipeline_mode<synchronous>, transform_indices = @transform_3, window_bounds = array<i64: 32, 32>}, {transform_indices = @transform_4, window_bounds = array<i64: 1, 8, 16>}]} {
    %c0 = arith.constant 0 : index
    %c0_0 = arith.constant 0 : index
    %c0_1 = arith.constant 0 : index
    %0 = vector.load %arg2[%c0, %c0_0, %c0_1] : memref<1x8x32xf32, #tpu.memory_space<vmem>>, vector<1x8x32xf32>
    %1 = vector.shape_cast %0 : vector<1x8x32xf32> to vector<8x32xf32>
    %c0_2 = arith.constant 0 : index
    %c0_3 = arith.constant 0 : index
    %c0_4 = arith.constant 0 : index
    %2 = vector.load %arg3[%c0_2, %c0_3, %c0_4] : memref<1x16x32xf32, #tpu.memory_space<vmem>>, vector<1x16x32xf32>
    %3 = vector.shape_cast %2 : vector<1x16x32xf32> to vector<16x32xf32>
    %c0_5 = arith.constant 0 : index
    %c0_6 = arith.constant 0 : index
    %4 = vector.load %arg4[%c0_5, %c0_6] : memref<32x32xf32, #tpu.memory_space<vmem>>, vector<32x32xf32>
    %c0_7 = arith.constant 0 : index
    %c0_8 = arith.constant 0 : index
    %5 = vector.load %arg5[%c0_7, %c0_8] : memref<32x32xf32, #tpu.memory_space<vmem>>, vector<32x32xf32>
    %cst = arith.constant dense<0.000000e+00> : vector<8x32xf32>
    %6 = tpu.matmul %1, %4, %cst {dimension_numbers = #tpu.dot_dimension_numbers<[1], [0], [0], [1], [0, 0, 1, 1], [], []>, precision = #tpu.contract_precision<fp32>} : vector<8x32xf32>, vector<32x32xf32>, vector<8x32xf32> -> vector<8x32xf32>
    %cst_9 = arith.constant 0.000000e+00 : f32
    %7 = vector.broadcast %cst_9 : f32 to vector<8x32xf32>
    %8 = arith.maximumf %6, %7 : vector<8x32xf32>
    %cst_10 = arith.constant dense<0.000000e+00> : vector<16x32xf32>
    %9 = tpu.matmul %3, %5, %cst_10 {dimension_numbers = #tpu.dot_dimension_numbers<[1], [0], [0], [1], [0, 0, 1, 1], [], []>, precision = #tpu.contract_precision<fp32>} : vector<16x32xf32>, vector<32x32xf32>, vector<16x32xf32> -> vector<16x32xf32>
    %cst_11 = arith.constant 0.000000e+00 : f32
    %10 = vector.broadcast %cst_11 : f32 to vector<16x32xf32>
    %11 = arith.maximumf %9, %10 : vector<16x32xf32>
    %cst_12 = arith.constant dense<0.000000e+00> : vector<8x16xf32>
    %12 = tpu.matmul %8, %11, %cst_12 {dimension_numbers = #tpu.dot_dimension_numbers<[1], [1], [0], [0], [0, 0, 1, 0], [], []>, precision = #tpu.contract_precision<fp32>} : vector<8x32xf32>, vector<16x32xf32>, vector<8x16xf32> -> vector<8x16xf32>
    %c0_13 = arith.constant 0 : index
    %c0_14 = arith.constant 0 : index
    %c0_15 = arith.constant 0 : index
    %13 = vector.load %arg6[%c0_13, %c0_14, %c0_15] : memref<1x8x16xf32, #tpu.memory_space<vmem>>, vector<1x8x16xf32>
    %14 = vector.shape_cast %13 : vector<1x8x16xf32> to vector<8x16xf32>
    %15 = vector.shape_cast %12 : vector<8x16xf32> to vector<1x8x16xf32>
    tpu.vector_store %arg6[%c0_13, %c0_14, %c0_15], %15 {strides = array<i32>} : memref<1x8x16xf32, #tpu.memory_space<vmem>>, vector<1x8x16xf32>,
    return
  }
  func.func @transform_0(%arg0: i32, %arg1: i32) -> (i32, i32, i32) {
    %c0_i32 = arith.constant 0 : i32
    %c0_i32_0 = arith.constant 0 : i32
    return %arg0, %arg1, %c0_i32 : i32, i32, i32
  }
  func.func @transform_1(%arg0: i32, %arg1: i32) -> (i32, i32, i32) {
    %c0_i32 = arith.constant 0 : i32
    %c0_i32_0 = arith.constant 0 : i32
    %c0_i32_1 = arith.constant 0 : i32
    return %arg0, %c0_i32, %c0_i32_0 : i32, i32, i32
  }
  func.func @transform_2(%arg0: i32, %arg1: i32) -> (i32, i32) {
    %c0_i32 = arith.constant 0 : i32
    %c0_i32_0 = arith.constant 0 : i32
    %c0_i32_1 = arith.constant 0 : i32
    return %c0_i32, %c0_i32_0 : i32, i32
  }
  func.func @transform_3(%arg0: i32, %arg1: i32) -> (i32, i32) {
    %c0_i32 = arith.constant 0 : i32
    %c0_i32_0 = arith.constant 0 : i32
    %c0_i32_1 = arith.constant 0 : i32
    return %c0_i32, %c0_i32_0 : i32, i32
  }
  func.func @transform_4(%arg0: i32, %arg1: i32) -> (i32, i32, i32) {
    %c0_i32 = arith.constant 0 : i32
    %c0_i32_0 = arith.constant 0 : i32
    return %arg0, %arg1, %c0_i32 : i32, i32, i32
  }
}

</mosaic_0001>

<bundles_post_ra>
// kernel: tpu_custom_call.1
= control target key start
LH: loop header
LB: loop body
LE: loop exit
PB: predicated region body
PF: predicated region fallthrough
CT: control target
= control target key end

     0   :  { %s3135_s0 = inlined_call_operand.hbm [shape: f32[2,8,32], index: 0, kind: input, shape index: {}]   ;;  %s3136_s1 = inlined_call_operand.hbm [shape: f32[2,16,32], index: 1, kind: input, shape index: {}]   ;;  %s3137_s2 = inlined_call_operand.hbm [shape: f32[32,32], index: 2, kind: input, shape index: {}]   ;;  %s3138_s3 = inlined_call_operand.hbm [shape: f32[32,32], index: 3, kind: input, shape index: {}]   ;;  %s3139_s4 = inlined_call_operand.hbm [shape: f32[2,8,16], index: 4, kind: output, shape index: {}]  }
   0x1   :  { %3145 = sst [smem:[#allocation16_spill]] %s3135_s0 }
   0x2   :  { %3146 = sst [smem:[#allocation17_spill]] %s3137_s2 }
   0x3   :  { %9 = vsyncpa [#allocation3], 0 }
   0x4   :  { %11 = vsyncpa [#allocation3 + $0x1], 0 }
   0x5   :  { %12 = vsyncpa [#allocation6], 0 }
   0x6   :  { %14 = vsyncpa [#allocation6 + $0x1], 0 }
   0x7   :  { %15 = vsyncpa [#allocation9], 0 }
   0x8   :  { %16 = vsyncpa [#allocation4], 0 }
   0x9   :  { %18 = vsyncpa [#allocation4 + $0x1], 0  ;;  %s2694_s15 = smov 0   ;;  %s2696_s16 = smov 0  }
   0xa   :  { %s2698_s17 = smov 0   ;;  %s2700_s18 = smov 0  }
   0xb   :  { %s2702_s19 = smov 0   ;;  %s2704_s20 = smov 0  }
   0xc LB: > { %s2725_s21 = sadd.s32 4294967295, %s2657_s20   ;;  %s1944_s22 = sadd.s32 4294967294, %s2657_s20   ;;  %s2657_s20 = sphi %s2704_s20, %s24_s20   ;;  %s2653_s19 = sphi %s2702_s19, %s3170_s19   ;;  %s2649_s18 = sphi %s2700_s18, %s3169_s18   ;;  %s2645_s17 = sphi %s2698_s17, %s3168_s17   ;;  %s2641_s16 = sphi %s2696_s16, %s3167_s16   ;;  %s2637_s15 = sphi %s2694_s15, %s3166_s15  }
   0xd   : > { %p58_p0 = scmp.ne.s32.totalorder %s2641_s16, %s2637_s15  ;;  %p3140_p1 = scmp.eq.s32.totalorder %s2725_s21, 0 }
   0xe   : > { %p158_p3 = scmp.eq.s32.totalorder %s1944_s22, 1  ;;  %p1945_p5 = scmp.ge.s32.totalorder %s2657_s20, 1 }
   0xf   : > { %p2734_p4 = por %p3140_p1, %p58_p0  ;;  %p165_p7 = scmp.lt.s32.totalorder %s2657_s20, 3 }
  0x10   : > { %p2739_p6 = por %p158_p3, %p58_p0  ;;  %s2659_s26 = smov [#allocation7]  }
  0x11   : > { %s3147_s23 = scalar_select %p2734_p4, 1, 0 }
  0x12   : > { %s3148_s24 = scalar_select %p2739_p6, 1, 0 }
  0x13   : > { %p2744_p8 = pnand %p1945_p5, %p165_p7  ;;  %s177_s27 = sshll.u32 %s2659_s26, 4  ;;  %s2748_s27 = int_to_ptr.vmem [resolvable:$true] %s177_s27 }
  0x14   : > { %s2660_s29 = smov [#allocation8]   ;;  %s3151_s2 = sld [smem:[#allocation17_spill]] }
  0x15   : > { %p2368_p9 = pneg %p2744_p8  ;;  %s190_s30 = sshll.u32 %s2660_s29, 4  ;;  %s2759_s30 = int_to_ptr.vmem [resolvable:$true] %s190_s30 }
  0x17   : > { %p2755_p11 = pnand %p2368_p9, %p3140_p1 }
  0x19   : > { %p2449_p13 = pneg %p2755_p11 }
  0x1a   : > { %s2447_s7 = scalar_lea.hbm %s3151_s2, 512 }
  0x1b   : > { %p2448_p12 = scmp.ne.s32.totalorder %s3151_s2, %s2447_s7  ;;  %p2454_p5 = scmp.lt.u32.totalorder %s2447_s7, %s3151_s2 }
  0x1d   : > { %p2450_p0 = pnand %p2449_p13, %p2448_p12 }
  0x1f   : > { %p2451_p3 = pneg %p2450_p0 }
  0x21   : > { %p2456_p7 = pnand %p2454_p5, %p2451_p3 }
  0x23   : > { %2459 = shalt.err (!%p2456_p7)
}
  0x24   : > { %s2460_s12 = scalar_lea.vmem %s2748_s27, 512  ;;  %p2468_p2 = scmp.lt.s32.totalorder %s2748_s27, %s2748_s27 }
  0x25   : > { %p2461_p9 = scmp.ne.s32.totalorder %s2748_s27, %s2460_s12  ;;  %p2469_p12 = scmp.lt.s32.totalorder %s2460_s12, %s2460_s12 }
  0x27   : > { %p2463_p10 = pnand %p2461_p9, %p2449_p13  ;;  %p2470_p0 = por %p2469_p12, %p2468_p2 }
  0x29   : > { %p2464_p1 = pneg %p2463_p10 }
  0x2b   : > { %p2471_p6 = pnand %p2470_p0, %p2464_p1 }
  0x2d   : > { %2474 = shalt.err (!%p2471_p6)
}
  0x2e   : > { %s3141_s13 = smov 128   ;;  %s3142_s14 = smov 8  }
  0x2f   : > { %2371 = dma.hbm_to_vmem [thread:$0]  (!%p2755_p11), %s3151_s2, 512, %s2748_s27, [#allocation6], %s3141_s13, %s3141_s13, %s3142_s14  }
  0x30   : > { %s2475_s6 = scalar_lea.hbm %s3138_s3, 512 }
  0x31   : > { %p2476_p1 = scmp.ne.s32.totalorder %s3138_s3, %s2475_s6  ;;  %p2482_p10 = scmp.lt.u32.totalorder %s2475_s6, %s3138_s3 }
  0x33   : > { %p2478_p2 = pnand %p2476_p1, %p2449_p13 }
  0x35   : > { %p2479_p6 = pneg %p2478_p2 }
  0x37   : > { %p2484_p3 = pnand %p2482_p10, %p2479_p6 }
  0x39   : > { %2487 = shalt.err (!%p2484_p3)
}
  0x3a   : > { %s2488_s27 = scalar_lea.vmem %s2759_s30, 512  ;;  %p2496_p12 = scmp.lt.s32.totalorder %s2759_s30, %s2759_s30 }
  0x3b   : > { %p2489_p5 = scmp.ne.s32.totalorder %s2759_s30, %s2488_s27  ;;  %p2497_p0 = scmp.lt.s32.totalorder %s2488_s27, %s2488_s27 }
  0x3d   : > { %p2491_p7 = pnand %p2489_p5, %p2449_p13  ;;  %p2498_p1 = por %p2497_p0, %p2496_p12 }
  0x3f   : > { %p2492_p9 = pneg %p2491_p7 }
  0x41   : > { %p2499_p2 = pnand %p2498_p1, %p2492_p9 }
  0x43   : > { %2502 = shalt.err (!%p2499_p2)
}
  0x44   : > { %2374 = dma.hbm_to_vmem [thread:$0]  (!%p2755_p11), %s3138_s3, 512, %s2759_s30, [#allocation9], %s3141_s13, %s3141_s13, %s3142_s14  }
  0x45   : > { %s36_s28 = sadd.s32 1, %s2653_s19  ;;  %s45_s22 = sadd.s32 1, %s2645_s17 }
  0x46   : > { %p38_p13 = scmp.ge.s32.totalorder %s36_s28, 2  ;;  %p52_p6 = scmp.ne.s32.totalorder %s2645_s17, %s2641_s16 }
  0x47   : > { %p53_p10 = scmp.eq.s32.totalorder %s2657_s20, 0  ;;  %p2388_p3 = scmp.lt.s32.totalorder %s2657_s20, 2 }
  0x48   : > { %s3172_s28 = smov (%p38_p13, %s36_s28), 0  ;;  %p3152_p7 = scmp.eq.s32.totalorder %s2725_s21, 1 }
  0x49   : > { %p54_p5 = por %p53_p10, %p52_p6  ;;  %s40_s29 = ssub.s32 %s2653_s19, %s3172_s28 }
  0x4a   : > { %p2829_p9 = por %p3152_p7, %p52_p6  ;;  %s2836_s5 = sand.u32 1, %s2645_s17  }
  0x4b   : > { %p43_p11 = scmp.eq.s32.totalorder %s40_s29, 0  ;;  %s1949_s30 = sshll.u32 %s2836_s5, 3 }
  0x4c   : > { %s3153_s26 = scalar_select %p2829_p9, 1, 0 }
  0x4d   : > { %s1950_s6 = sshll.u32 %s2653_s19, 7  ;;  %s3154_s0 = sld [smem:[#allocation16_spill]] }
  0x4e   : > { %s2841_s7 = scalar_select %p43_p11, %s2645_s17, %s45_s22  }
  0x4f   : > { %s208_s27 = scalar_lea.vmem [#allocation2], %s1949_s30  ;;  %p2850_p12 = pnand %p2388_p3, %p54_p5 }
  0x50   : > { %s216_s11 = sshll.u32 %s208_s27, 4  ;;  %s1951_s22 = sshll.u32 %s2836_s5, 4  ;;  %s2854_s11 = int_to_ptr.vmem [resolvable:$true] %s216_s11 }
  0x51   : > { %s205_s29 = scalar_lea.sflag [#allocation3], %s2836_s5  ;;  %p2505_p1 = pneg %p2850_p12 }
  0x53   : > { %s2846_s10 = scalar_lea.hbm %s3154_s0, %s1950_s6  ;;  %s2508_s9 = scalar_lea.hbm %s3154_s0, 256 }
  0x54   : > { %s2503_s8 = scalar_lea.hbm %s2846_s10, 128  ;;  %p2509_p6 = scmp.lt.u32.totalorder %s2846_s10, %s3154_s0 }
  0x55   : > { %p2504_p0 = scmp.ne.s32.totalorder %s2846_s10, %s2503_s8  ;;  %p2510_p10 = scmp.lt.u32.totalorder %s2508_s9, %s2503_s8 }
  0x56   : > { %p2512_p5 = scmp.lt.u32.totalorder %s2503_s8, %s2846_s10 }
  0x57   : > { %p2506_p2 = pnand %p2505_p1, %p2504_p0  ;;  %p2511_p3 = por %p2510_p10, %p2509_p6 }
  0x59   : > { %p2507_p13 = pneg %p2506_p2  ;;  %p2513_p7 = por %p2512_p5, %p2511_p3 }
  0x5b   : > { %p2514_p11 = pnand %p2513_p7, %p2507_p13 }
  0x5d   : > { %2517 = shalt.err (!%p2514_p11)
}
  0x5e   : > { %s2518_s14 = scalar_lea.vmem %s2854_s11, 128  ;;  %s2663_s30 = smov [#allocation2]  }
  0x5f   : > { %p2519_p0 = scmp.ne.s32.totalorder %s2854_s11, %s2518_s14  ;;  %s2523_s6 = sshll.u32 %s2663_s30, 4  ;;  %s2524_s6 = int_to_ptr.vmem [resolvable:$false] %s2523_s6 }
  0x60   : > { %s2525_s13 = scalar_lea.vmem %s2524_s6, 256  ;;  %p2526_p4 = scmp.lt.s32.totalorder %s2854_s11, %s2524_s6 }
  0x61   : > { %p2521_p2 = pnand %p2519_p0, %p2505_p1  ;;  %p2527_p6 = scmp.lt.s32.totalorder %s2525_s13, %s2518_s14 }
  0x63   : > { %p2522_p9 = pneg %p2521_p2  ;;  %p2528_p10 = por %p2527_p6, %p2526_p4 }
  0x65   : > { %p2529_p3 = pnand %p2528_p10, %p2522_p9 }
  0x67   : > { %2532 = shalt.err (!%p2529_p3)
}
  0x68   : > { %2378 = dma.hbm_to_vmem [thread:$0]  (!%p2850_p12), %s2846_s10, 128, %s2854_s11, %s205_s29  }
  0x69   : > { %s1964_s8 = sshll.u32 %s2653_s19, 8  ;;  %s227_s9 = scalar_lea.vmem [#allocation5], %s1951_s22 }
  0x6a   : > { %s234_s27 = sshll.u32 %s227_s9, 4  ;;  %s223_s30 = sand.u32 1, %s2657_s20   ;;  %s2886_s27 = int_to_ptr.vmem [resolvable:$true] %s234_s27 }
  0x6b   : > { %s2892_s13 = scalar_lea.hbm %s3136_s1, %s1964_s8  ;;  %s2894_s0 = scalar_lea.sflag [#allocation6], %s223_s30 }
  0x6c   : > { %s2533_s2 = scalar_lea.hbm %s2892_s13, 256  ;;  %s2538_s11 = scalar_lea.hbm %s3136_s1, 512 }
  0x6d   : > { %p2534_p4 = scmp.ne.s32.totalorder %s2892_s13, %s2533_s2  ;;  %p2539_p5 = scmp.lt.u32.totalorder %s2892_s13, %s3136_s1 }
  0x6e   : > { %p2540_p7 = scmp.lt.u32.totalorder %s2538_s11, %s2533_s2  ;;  %p2542_p0 = scmp.lt.u32.totalorder %s2533_s2, %s2892_s13 }
  0x6f   : > { %p2536_p9 = pnand %p2534_p4, %p2505_p1 }
  0x70   : > { %p2541_p11 = por %p2540_p7, %p2539_p5 }
  0x71   : > { %p2537_p13 = pneg %p2536_p9 }
  0x72   : > { %p2543_p2 = por %p2542_p0, %p2541_p11 }
  0x74   : > { %p2544_p6 = pnand %p2543_p2, %p2537_p13 }
  0x76   : > { %2547 = shalt.err (!%p2544_p6)
}
  0x77   : > { %s2548_s8 = scalar_lea.vmem %s2886_s27, 256  ;;  %s2664_s9 = smov [#allocation5]  }
  0x78   : > { %p2549_p10 = scmp.ne.s32.totalorder %s2886_s27, %s2548_s8  ;;  %s2553_s30 = sshll.u32 %s2664_s9, 4  ;;  %s2554_s30 = int_to_ptr.vmem [resolvable:$false] %s2553_s30 }
  0x79   : > { %s2555_s14 = scalar_lea.vmem %s2554_s30, 512  ;;  %p2556_p9 = scmp.lt.s32.totalorder %s2886_s27, %s2554_s30 }
  0x7a   : > { %p2551_p3 = pnand %p2549_p10, %p2505_p1  ;;  %p2557_p5 = scmp.lt.s32.totalorder %s2555_s14, %s2548_s8 }
  0x7c   : > { %p2552_p4 = pneg %p2551_p3  ;;  %p2558_p7 = por %p2557_p5, %p2556_p9 }
  0x7e   : > { %p2559_p11 = pnand %p2558_p7, %p2552_p4 }
  0x80   : > { %2562 = shalt.err (!%p2559_p11)
}
  0x81   : > { %s3156_s2 = smov 8   ;;  %s3157_s6 = smov 128  }
  0x82   : > { %2381 = dma.hbm_to_vmem [thread:$0]  (!%p2850_p12), %s2892_s13, 256, %s2886_s27, %s2894_s0, %s3157_s6, %s3157_s6, %s3156_s2  }
  0x83   : > { %246 = sbr.rel (%p2744_p8) target bundleno = 719 (0x2cf), region = 36  ;;  %s2926_s5 = sand.u32 (!%p2744_p8), 1, %s2641_s16  }
  0x84   : > { %s1955_s10 = sshll.u32 (!%p2744_p8), %s2926_s5, 3  ;;  %s249_s11 = scalar_lea.sflag (!%p2744_p8), [#allocation3], %s2926_s5 }
  0x85   : > { %s252_s12 = scalar_lea.vmem (!%p2744_p8), [#allocation2], %s1955_s10  ;;  %p3158_p1 = scmp.ne.s32.totalorder (!%p2744_p8), %s3147_s23, 0 }
  0x8a   : > { %2616 = dma.done.wait (%p3158_p1), %s249_s11, 128  }
  0x8b   : > { %2618 = vsyncadd (%p3158_p1), %s249_s11, 4294967168  ;;  %s257_s0 = sand.u32 1, %s2725_s21   ;;  %s1956_s25 = sshll.u32 %s2926_s5, 4 }
  0x8c   : > { %s258_s27 = scalar_lea.sflag [#allocation6], %s257_s0  ;;  %s2938_s13 = scalar_lea.vmem [#allocation5], %s1956_s25 }
  0x8d   : > { %2620 = dma.done.wait (%p3158_p1), %s258_s27, 256  }
  0x8e   : > { %2622 = vsyncadd (%p3158_p1), %s258_s27, 4294967040  ;;  %p3159_p8 = scmp.eq.s32.totalorder %s2725_s21, 0 }
  0x90   : > { %2624 = dma.done.wait (%p3159_p8), [#allocation6], 512   ;;  %p3160_p12 = pmov %p3159_p8 }
  0x91   : > { %p3161_p13 = pmov %p3159_p8 }
  0x92   : > { %2626 = vsyncadd (%p3160_p12), [#allocation6], 4294966784 }
  0x93   : > { %2628 = dma.done.wait (%p3161_p13), [#allocation9], 512   ;;  %p3162_p0 = pmov %p3159_p8 }
  0x94   : > { %v2665_v0 = vmov 0.0|0.0   ;;  %vm2666_vm0 = vmmov 0   ;;  %v2667_v1 = vmov 0.0   ;;  %vm310_vm1 = vcmask 261120   ;;  %v302_v2 = vld [vmem:[#allocation7] sm:$0xff]  ;;  %v303_v3 = vld [vmem:[#allocation7 + $0x8] sm:$0xff] }
  0x95   : > { %2630 = vsyncadd (%p3162_p0), [#allocation9], 4294966784  ;;  %2223 = vmatprep.subr.bf16.mxu1 %v2665_v0  ;;  %2241 = vmatprep.subr.bf16.mxu0 %v2665_v0  ;;  %v304_v4 = vld [vmem:[#allocation7 + $0x10] sm:$0xff]  ;;  %v315_v5 = vand.u32 4294901760, %v302_v2  ;;  %v318_v6 = vand.u32 4294901760, %v303_v3  ;;  %v305_v7 = vld [vmem:[#allocation7 + $0x18] sm:$0xff] }
  0x96   : > { %2057 = vmatprep.mubr.msk.f32.mxu1 %vm2666_vm0, %v2667_v1  ;;  %2090 = vmatprep.mubr.msk.f32.mxu0 %vm2666_vm0, %v2667_v1  ;;  %v321_v8 = vand.u32 4294901760, %v304_v4  ;;  %v299_v9 = vld [vmem:[%s252_s12] sm:$0xff]  ;;  %v324_v10 = vand.u32 4294901760, %v305_v7  ;;  %v300_v27 = vld [vmem:[%s2938_s13] sm:$0xff]  ;;  %v307_v34 = vld [vmem:[#allocation8 + $0x8] sm:$0xff]  ;;  %s1961_s21 = sshll.u32 %s2649_s18, 7 }
  0x97   : > { %v312_v11 = vsel %vm310_vm1, %v299_v9, 0  ;;  %v2959_v12 = vpack.c.bf16 %v318_v6, %v315_v5  ;;  %v2961_v13 = vsub.f32 %v302_v2, %v315_v5  ;;  %v2963_v14 = vsub.f32 %v303_v3, %v318_v6  ;;  %v306_v33 = vld [vmem:[#allocation8] sm:$0xff]  ;;  %v301_v44 = vld [vmem:[%s2938_s13 + $0x8] sm:$0xff]  ;;  %v308_v46 = vld [vmem:[#allocation8 + $0x10] sm:$0xff]  ;;  %s298_s23 = scalar_lea.vmem [#allocation10], %s1955_s10  ;;  %s3086_s9 = scalar_lea.hbm %s3139_s4, %s1961_s21 }
  0x98   : > { %v2965_v15 = vsub.f32 %v304_v4, %v321_v8  ;;  %v2967_v16 = vsub.f32 %v305_v7, %v324_v10  ;;  %v2969_v17 = vand.u32 4294901760, %v312_v11  ;;  %v2973_v18 = vpack.c.bf16 %v324_v10, %v321_v8  ;;  %v309_v47 = vld [vmem:[#allocation8 + $0x18] sm:$0xff]  ;;  %s1821_s22 = sshll.u32 %s298_s23, 4  ;;  %s1807_s30 = scalar_lea.sflag [#allocation4], %s2926_s5  ;;  %s3088_s22 = int_to_ptr.vmem [resolvable:$true] %s1821_s22 }
  0x99   : > { %2225 = vmatpush3.bf16.msra.mxu1 %v2959_v12  ;;  %2243 = vmatpush3.bf16.msra.mxu0 %v2959_v12  ;;  %v396_v19 = vand.u32 4294901760, %v2961_v13  ;;  %v403_v20 = vand.u32 4294901760, %v2963_v14  ;;  %v801_v36 = vsel %vm310_vm1, %v300_v27, 0  ;;  %v807_v42 = vand.u32 4294901760, %v306_v33  ;;  %s2563_s14 = scalar_lea.vmem %s3088_s22, 128  ;;  %p3163_p6 = scmp.ne.s32.totalorder %s3153_s26, 0 }
  0x9a   : > { %v410_v21 = vand.u32 4294901760, %v2965_v15  ;;  %2226 = vmatprep.subr.bf16.mxu1 %v2665_v0  ;;  %2244 = vmatprep.subr.bf16.mxu0 %v2665_v0  ;;  %v2981_v22 = vsub.f32 %v312_v11, %v2969_v17  ;;  %v417_v23 = vand.u32 4294901760, %v2967_v16  ;;  %v2996_v40 = vand.u32 4294901760, %v801_v36  ;;  %p2564_p2 = scmp.ne.s32.totalorder %s3088_s22, %s2563_s14  ;;  %s2668_s18 = smov [#allocation10]  }
  0x9b   : > { %v397_v24 = vsub.f32 %v2961_v13, %v396_v19  ;;  %v404_v25 = vsub.f32 %v2963_v14, %v403_v20  ;;  %v2248_v32 = vpack.c.bf16 %v403_v20, %v396_v19  ;;  %v810_v43 = vand.u32 4294901760, %v307_v34  ;;  %s2567_s2 = sshll.u32 %s2668_s18, 4  ;;  %s2568_s2 = int_to_ptr.vmem [resolvable:$false] %s2567_s2 }
  0x9c   : > { %v411_v26 = vsub.f32 %v2965_v15, %v410_v21  ;;  %v385_v28 = vand.u32 4294901760, %v2981_v22  ;;  %v418_v29 = vsub.f32 %v2967_v16, %v417_v23  ;;  %v2251_v45 = vpack.c.bf16 %v417_v23, %v410_v21  ;;  %p2565_p10 = pnand %p2564_p2, %p3163_p6  ;;  %s2569_s6 = scalar_lea.vmem %s2568_s2, 256 }
  0x9d   : > { %2228 = vmatpush3.bf16.msra.mxu1 %v2973_v18  ;;  %2246 = vmatpush3.bf16.msra.mxu0 %v2973_v18  ;;  %v398_v30 = vand.u32 4294901760, %v397_v24  ;;  %v405_v31 = vand.u32 4294901760, %v404_v25  ;;  %v3005_v49 = vsub.f32 %v801_v36, %v2996_v40  ;;  %v804_v50 = vsel %vm310_vm1, %v301_v44, 0  ;;  %p2570_p4 = scmp.lt.s32.totalorder %s3088_s22, %s2568_s2  ;;  %p2571_p9 = scmp.lt.s32.totalorder %s2569_s6, %s2563_s14 }
  0x9e   : > { %v386_v35 = vsub.f32 %v2981_v22, %v385_v28  ;;  %2229 = vmatprep.subr.bf16.mxu1 %v2665_v0  ;;  %2247 = vmatprep.subr.bf16.mxu0 %v2665_v0  ;;  %v412_v38 = vand.u32 4294901760, %v411_v26  ;;  %v419_v39 = vand.u32 4294901760, %v418_v29  ;;  %v813_v51 = vand.u32 4294901760, %v308_v46  ;;  %p2566_p3 = pneg %p2565_p10 }
  0x9f   : > { %v2230_v37 = vpack.c.bf16 %v405_v31, %v398_v30  ;;  %v816_v52 = vand.u32 4294901760, %v309_v47  ;;  %v3009_v53 = vsub.f32 %v306_v33, %v807_v42  ;;  %v3011_v54 = vsub.f32 %v307_v34, %v810_v43  ;;  %p2572_p5 = por %p2571_p9, %p2570_p4 }
  0xa0   : > { %v387_v41 = vand.u32 4294901760, %v386_v35  ;;  %2091 = vmatmul.mubr.f32.vlgmr.msra.gmra.mrb[0].mxu0 %v385_v28  ;;  %v2233_v48 = vpack.c.bf16 %v419_v39, %v412_v38  ;;  %v3014_v55 = vand.u32 4294901760, %v804_v50  ;;  %v2236_v56 = vpack.c.bf16 %v2963_v14, %v2961_v13 }
  0xa1   : > { %2249 = vmatpush3.bf16.msra.mxu0 %v2248_v32  ;;  %2101 = vmatprep.mubr.msk.f32.mxu0 %vm2666_vm0, %v2667_v1  ;;  %v877_v57 = vand.u32 4294901760, %v3005_v49  ;;  %v898_v58 = vand.u32 4294901760, %v3009_v53  ;;  %v905_v59 = vand.u32 4294901760, %v3011_v54  ;;  %v3023_v60 = vsub.f32 %v308_v46, %v813_v51  ;;  %p2573_p7 = pnand %p2572_p5, %p2566_p3 }
  0xa2   : > { %2058 = vmatmul.mubr.f32.vlgmr.msra.gmra.mrb[0].mxu1 %v387_v41  ;;  %2250 = vmatprep.subr.bf16.mxu0 %v2665_v0  ;;  %v3025_v61 = vsub.f32 %v309_v47, %v816_v52  ;;  %v886_v62 = vsub.f32 %v804_v50, %v3014_v55  ;;  %v2239_v63 = vpack.c.bf16 %v2967_v16, %v2965_v15  ;;  %vm1804_vm2 = vcmask 130048  }
  0xa3   : > { %2231 = vmatpush3.bf16.msra.mxu1 %v2230_v37  ;;  %2068 = vmatprep.mubr.msk.f32.mxu1 %vm2666_vm0, %v2667_v1  ;;  %v2259_v2 = vpack.c.bf16 %v810_v43, %v807_v42  ;;  %v878_v3 = vsub.f32 %v3005_v49, %v877_v57  ;;  %v899_v4 = vsub.f32 %v3009_v53, %v898_v58  ;;  %v912_v6 = vand.u32 4294901760, %v3023_v60 }
  0xa4   : > { %2232 = vmatprep.subr.bf16.mxu1 %v2665_v0  ;;  %v906_v5 = vsub.f32 %v3011_v54, %v905_v59  ;;  %v919_v7 = vand.u32 4294901760, %v3025_v61  ;;  %v887_v8 = vand.u32 4294901760, %v886_v62  ;;  %v2263_v9 = vpack.c.bf16 %v816_v52, %v813_v51 }
  0xa5   : > { %2252 = vmatpush3.bf16.msra.mxu0 %v2251_v45  ;;  %v879_v10 = vand.u32 4294901760, %v878_v3  ;;  %v900_v11 = vand.u32 4294901760, %v899_v4  ;;  %v913_v13 = vsub.f32 %v3023_v60, %v912_v6  ;;  %v2275_v21 = vpack.c.bf16 %v3011_v54, %v3009_v53 }
  0xa6   : > { %2253 = vmatprep.subr.bf16.mxu0 %v2665_v0  ;;  %v920_v14 = vsub.f32 %v3025_v61, %v919_v7  ;;  %v888_v15 = vsub.f32 %v886_v62, %v887_v8  ;;  %v2291_v23 = vpack.c.bf16 %v905_v59, %v898_v58  ;;  %v2295_v24 = vpack.c.bf16 %v919_v7, %v912_v6 }
  0xa7   : > { %2234 = vmatpush3.bf16.msra.mxu1 %v2233_v48 }
  0xa8   : > { %2235 = vmatprep.subr.bf16.mxu1 %v2665_v0  ;;  %2102 = vmatmul.mubr.f32.vlgmr.msra.gmra.mrb[0].mxu0 %v2969_v17  ;;  %v921_v19 = vand.u32 4294901760, %v920_v14 }
  0xa9   : > { %2255 = vmatpush3.bf16.msra.mxu0 %v2959_v12  ;;  %2112 = vmatprep.mubr.msk.f32.mxu0 %vm2666_vm0, %v2667_v1  ;;  %v907_v12 = vand.u32 4294901760, %v906_v5 }
  0xaa   : > { %2069 = vmatmul.mubr.f32.vlgmr.msra.gmra.mrb[0].mxu1 %v2969_v17  ;;  %2256 = vmatprep.subr.bf16.mxu0 %v2665_v0 }
  0xab   : > { %2237 = vmatpush3.bf16.msra.mxu1 %v2236_v56  ;;  %2079 = vmatprep.mubr.msk.f32.mxu1 %vm2666_vm0, %v2667_v1  ;;  %v2267_v16 = vpack.c.bf16 %v907_v12, %v900_v11 }
  0xac   : > { %2238 = vmatprep.subr.bf16.mxu1 %v2665_v0 }
  0xad   : > { %2258 = vmatpush3.bf16.msra.mxu0 %v2973_v18  ;;  %v914_v18 = vand.u32 4294901760, %v913_v13 }
  0xae   : > { %2307 = vmatprep.subr.bf16.mxu0 %v2665_v0 }
  0xaf   : > { %2240 = vmatpush3.bf16.msra.mxu1 %v2239_v63  ;;  %v2271_v20 = vpack.c.bf16 %v921_v19, %v914_v18 }
  0xb0   : > { %2113 = vmatmul.mubr.f32.vlgmr.msra.gmra.mrb[0].mxu0 %v2969_v17  ;;  %2260 = vmatprep.subr.bf16.mxu1 %v2259_v2  ;;  %v889_v17 = vand.u32 4294901760, %v888_v15 }
  0xb1   : > { %2185 = vmatprep.mubr.msk.f32.mxu0 %vm2666_vm0, %v2667_v1 }
  0xb2   : > { %2080 = vmatmul.mubr.f32.vlgmr.msra.gmra.mrb[0].mxu1 %v2981_v22  ;;  %v2279_v22 = vpack.c.bf16 %v3025_v61, %v3023_v60 }
  0xb3   : > { %2262 = vmatpush3.bf16.msra.mxu1 %v2259_v2  ;;  %2123 = vmatprep.mubr.f32.mxu1 %v879_v10 }
  0xb4   : > { %2264 = vmatprep.subr.bf16.mxu1 %v2263_v9 }
  0xb7   : > { %2266 = vmatpush3.bf16.msra.mxu1 %v2263_v9 }
  0xb8   : > { %2268 = vmatprep.subr.bf16.mxu1 %v2267_v16 }
  0xba   : > { %2124 = vmatmul.mubr.f32.vlgmr.msra.gmra.mrb[2].mxu1 %v889_v17 }
  0xbb   : > { %2270 = vmatpush3.bf16.msra.mxu1 %v2267_v16  ;;  %2134 = vmatprep.mubr.f32.mxu1 %v2996_v40 }
  0xbc   : > { %2272 = vmatprep.subr.bf16.mxu1 %v2271_v20 }
  0xbf   : > { %2274 = vmatpush3.bf16.msra.mxu1 %v2271_v20 }
  0xc0   : > { %2276 = vmatprep.subr.bf16.mxu1 %v2275_v21 }
  0xc2   : > { %2135 = vmatmul.mubr.f32.vlgmr.msra.gmra.mrb[2].mxu1 %v3014_v55 }
  0xc3   : > { %2278 = vmatpush3.bf16.msra.mxu1 %v2275_v21  ;;  %2145 = vmatprep.mubr.f32.mxu1 %v3005_v49 }
  0xc4   : > { %2280 = vmatprep.subr.bf16.mxu1 %v2279_v22 }
  0xc7   : > { %2282 = vmatpush3.bf16.msra.mxu1 %v2279_v22 }
  0xc8   : > { %2284 = vmatprep.subr.bf16.mxu1 %v2259_v2 }
  0xca   : > { %2146 = vmatmul.mubr.f32.vlgmr.msra.gmra.mrb[2].mxu1 %v886_v62 }
  0xcb   : > { %2286 = vmatpush3.bf16.msra.mxu1 %v2259_v2  ;;  %2156 = vmatprep.mubr.f32.mxu1 %v877_v57 }
  0xcc   : > { %2288 = vmatprep.subr.bf16.mxu1 %v2263_v9 }
  0xcf   : > { %2290 = vmatpush3.bf16.msra.mxu1 %v2263_v9 }
  0xd0   : > { %2292 = vmatprep.subr.bf16.mxu1 %v2291_v23 }
  0xd2   : > { %2157 = vmatmul.mubr.f32.vlgmr.msra.gmra.mrb[2].mxu1 %v887_v8 }
  0xd3   : > { %2294 = vmatpush3.bf16.msra.mxu1 %v2291_v23  ;;  %2167 = vmatprep.mubr.f32.mxu1 %v2996_v40 }
  0xd4   : > { %2296 = vmatprep.subr.bf16.mxu1 %v2295_v24 }
  0xd7   : > { %2298 = vmatpush3.bf16.msra.mxu1 %v2295_v24 }
  0xd8   : > { %2300 = vmatprep.subr.bf16.mxu1 %v2259_v2 }
  0xda   : > { %2168 = vmatmul.mubr.f32.vlgmr.msra.gmra.mrb[2].mxu1 %v3014_v55 }
  0xdb   : > { %2302 = vmatpush3.bf16.msra.mxu1 %v2259_v2  ;;  %2178 = vmatprep.mubr.f32.mxu1 %v2996_v40 }
  0xdc   : > { %2304 = vmatprep.subr.bf16.mxu1 %v2263_v9 }
  0xdf   : > { %2306 = vmatpush3.bf16.msra.mxu1 %v2263_v9 }
  0xe2   : > { %2179 = vmatmul.mubr.f32.vlgmr.msra.gmra.mrb[2].mxu1 %v3014_v55 }
 0x183   : > { %v795_v25 = vpop.f32.mrb[0].mxu0 }
 0x184   : > { %v2114_v26 = vpop.f32.mrb[1].mxu0 }
 0x185   : > { %v560_v27 = vpop.f32.mrb[0].mxu1 }
 0x186   : > { %v2325_v28 = vadd.f32 %v795_v25, %v560_v27  ;;  %v2081_v29 = vpop.f32.mrb[1].mxu1 }
 0x188   : > { %v799_v30 = vmax.f32 %v2325_v28, 0.0 }
 0x18a   : > { %v1337_v31 = vsel %vm310_vm1, %v799_v30, 0 }
 0x18b   : > { %v1412_v32 = vand.u32 4294901760, %v1337_v31 }
 0x18d   : > { %v1413_v36 = vsub.f32 %v1337_v31, %v1412_v32 }
 0x18f   : > { %v1414_v42 = vand.u32 4294901760, %v1413_v36 }
 0x191   : > { %v1415_v50 = vsub.f32 %v1413_v36, %v1414_v42 }
 0x193   : > { %v1416_v55 = vand.u32 4294901760, %v1415_v50 }
 0x1b5   : > { %v2180_v33 = vpop.f32.mrb[2].mxu1 }
 0x1b6   : > { %v1335_v34 = vmax.f32 %v2180_v33, 0.0  ;;  %v1324_v35 = vpop.f32.mrb[3].mxu1 }
 0x1b7   : > { %v1334_v37 = vmax.f32 %v1324_v35, 0.0 }
 0x1b8   : > { %v1343_v38 = vsel %vm310_vm1, %v1335_v34, 0 }
 0x1b9   : > { %v1349_v39 = vand.u32 4294901760, %v1343_v38  ;;  %v1340_v40 = vsel %vm310_vm1, %v1334_v37, 0 }
 0x1ba   : > { %v1346_v41 = vand.u32 4294901760, %v1340_v40 }
 0x1bb   : > { %v1431_v43 = vsub.f32 %v1343_v38, %v1349_v39 }
 0x1bc   : > { %v2308_v44 = vpack.c.bf16 %v1349_v39, %v1346_v41  ;;  %v1424_v45 = vsub.f32 %v1340_v40, %v1346_v41 }
 0x1bd   : > { %v1432_v46 = vand.u32 4294901760, %v1431_v43 }
 0x1be   : > { %v1425_v47 = vand.u32 4294901760, %v1424_v45  ;;  %v2314_v48 = vpack.c.bf16 %v1431_v43, %v1424_v45  ;;  %2309 = vmatpush3.bf16.xpose.msra.mxu0 %v2308_v44 }
 0x1bf   : > { %v1433_v49 = vsub.f32 %v1431_v43, %v1432_v46  ;;  %2310 = vmatprep.subr.bf16.mxu0 %v2665_v0 }
 0x1c0   : > { %v1426_v51 = vsub.f32 %v1424_v45, %v1425_v47  ;;  %v2320_v52 = vpack.c.bf16 %v1432_v46, %v1425_v47 }
 0x1c1   : > { %v1434_v53 = vand.u32 4294901760, %v1433_v49 }
 0x1c2   : > { %v1427_v54 = vand.u32 4294901760, %v1426_v51 }
 0x1c4   : > { %v2311_v56 = vpack.c.bf16 %v1434_v53, %v1427_v54 }
 0x1c5   : > { %2186 = vmatmul.mubr.f32.vlgmr.msra.gmra.mrb[2].mxu0 %v1416_v55 }
 0x1c6   : > { %2312 = vmatpush3.bf16.xpose.msra.mxu0 %v2311_v56  ;;  %2192 = vmatprep.mubr.msk.f32.mxu0 %vm2666_vm0, %v2667_v1 }
 0x1c7   : > { %2313 = vmatprep.subr.bf16.mxu0 %v2665_v0 }
 0x1cd   : > { %2193 = vmatmul.mubr.f32.vlgmr.msra.gmra.mrb[2].mxu0 %v1412_v32 }
 0x1ce   : > { %2315 = vmatpush3.bf16.xpose.msra.mxu0 %v2314_v48  ;;  %2199 = vmatprep.mubr.msk.f32.mxu0 %vm2666_vm0, %v2667_v1 }
 0x1cf   : > { %2316 = vmatprep.subr.bf16.mxu0 %v2665_v0 }
 0x1d5   : > { %2200 = vmatmul.mubr.f32.vlgmr.msra.gmra.mrb[2].mxu0 %v1413_v36 }
 0x1d6   : > { %2318 = vmatpush3.bf16.xpose.msra.mxu0 %v2308_v44  ;;  %2206 = vmatprep.mubr.msk.f32.mxu0 %vm2666_vm0, %v2667_v1 }
 0x1d7   : > { %2319 = vmatprep.subr.bf16.mxu0 %v2665_v0 }
 0x1dd   : > { %2207 = vmatmul.mubr.f32.vlgmr.msra.gmra.mrb[2].mxu0 %v1414_v42 }
 0x1de   : > { %2321 = vmatpush3.bf16.xpose.msra.mxu0 %v2320_v52  ;;  %2213 = vmatprep.mubr.msk.f32.mxu0 %vm2666_vm0, %v2667_v1 }
 0x1df   : > { %2322 = vmatprep.subr.bf16.mxu0 %v2665_v0 }
 0x1e5   : > { %2214 = vmatmul.mubr.f32.vlgmr.msra.gmra.mrb[2].mxu0 %v1412_v32 }
 0x1e6   : > { %2324 = vmatpush3.bf16.xpose.msra.mxu0 %v2308_v44  ;;  %2220 = vmatprep.mubr.msk.f32.mxu0 %vm2666_vm0, %v2667_v1 }
 0x1ed   : > { %2221 = vmatmul.mubr.f32.vlgmr.msra.gmra.mrb[2].mxu0 %v1412_v32 }
 0x2c0   : > { %v1800_v0 = vpop.f32.mrb[2].mxu0 }
 0x2c1   : > { %1805 = vst.msk [vmem:[%s298_s23] sm:$0xff] %vm1804_vm2, %v1800_v0  ;;  %v2222_v57 = vpop.f32.mrb[3].mxu0 }
 0x2c2   : > { %2576 = shalt.err (!%p2573_p7)
}
 0x2c3   : > { %s2577_s5 = scalar_lea.hbm %s3086_s9, 128  ;;  %s2581_s12 = scalar_lea.hbm %s3139_s4, 256 }
 0x2c4   : > { %p2578_p11 = scmp.ne.s32.totalorder %s3086_s9, %s2577_s5  ;;  %p2582_p12 = scmp.lt.u32.totalorder %s3086_s9, %s3139_s4 }
 0x2c5   : > { %p2583_p13 = scmp.lt.u32.totalorder %s2581_s12, %s2577_s5  ;;  %p2585_p2 = scmp.lt.u32.totalorder %s2577_s5, %s3086_s9 }
 0x2c6   : > { %p2579_p1 = pnand %p2578_p11, %p3163_p6 }
 0x2c7   : > { %p2584_p0 = por %p2583_p13, %p2582_p12 }
 0x2c8   : > { %p2580_p8 = pneg %p2579_p1 }
 0x2c9   : > { %p2586_p10 = por %p2585_p2, %p2584_p0 }
 0x2cb   : > { %p2587_p3 = pnand %p2586_p10, %p2580_p8 }
 0x2cd   : > { %2590 = shalt.err (!%p2587_p3)
}
 0x2ce   : > { %2366 = dma.vmem_to_hbm [thread:$0]  (%p3163_p6), %s3088_s22, 128, %s3086_s9, %s1807_s30  }
 0x2cf PF: > { %s1833_s27 = sand.u32 1, %s2637_s15   ;;  %p3164_p4 = scmp.ne.s32.totalorder %s3148_s24, 0 }
 0x2d0   : > { %p3165_p9 = scmp.ge.s32.totalorder %s2657_s20, 2  ;;  %s1834_s13 = scalar_lea.sflag [#allocation4], %s1833_s27 }
 0x2d2   : > { %p2383_p5 = pnand %p3165_p9, %p3164_p4 }
 0x2d4   : > { %2632 = dma.done.wait (!%p2383_p5), %s1834_s13, 128  }
 0x2d5   : > { %2634 = vsyncadd (!%p2383_p5), %s1834_s13, 4294967168  ;;  %s24_s20 = sadd.s32 1, %s2657_s20   ;;  %s3166_s15 = smov %s2641_s16 }
 0x2d6   : > { %p21_p7 = scmp.ge.s32.totalorder %s24_s20, 4   ;;  %s3167_s16 = smov %s2645_s17 }
 0x2d7   : > { %s3168_s17 = smov %s2841_s7  ;;  %s3169_s18 = smov %s2653_s19 }
 0x2d8   : > { %s3170_s19 = smov %s3172_s28  ;;  %23 = sbr.rel (!%p21_p7) target bundleno = 12 (0xc), region = 102 }
 0x2df   :  { %1839 = vsyncpa [#allocation3], 1 }
 0x2e0   :  { %1841 = vsyncpa [#allocation3 + $0x1], 1 }
 0x2e1   :  { %1842 = vsyncpa [#allocation6], 1 }
 0x2e2   :  { %1844 = vsyncpa [#allocation6 + $0x1], 1 }
 0x2e3   :  { %1845 = vsyncpa [#allocation9], 1 }
 0x2e4   :  { %1846 = vsyncpa [#allocation4], 1 }
 0x2e5   :  { %1848 = vsyncpa [#allocation4 + $0x1], 1 }

</bundles_post_ra>
